<compile_context>
chip_gen: v7x
topology: tpu7x:2x2x1
jax: 0.10.0
libtpu: 0.0.40
codegen_flags: <defaults>
</compile_context>

<pallas_src>
import math

import jax
import jax.numpy as jnp
from jax.experimental import pallas as pl
from jax.experimental.pallas import tpu as pltpu

LEAKY_SLOPE = 0.01  # torch.nn.LeakyReLU default negative_slope
LANE = 128
SUBLANE = 8


def _leaky_relu(x):
    # max(x, 0.01*x): equals x for x>=0, 0.01*x for x<0.
    return jnp.maximum(x, LEAKY_SLOPE * x)


def _round_up(x, m):
    return ((x + m - 1) // m) * m


# ----------------------------------------------------------------------------
# Kernel
# ----------------------------------------------------------------------------
def critic_kernel(s_ref, a_ref, w1s_ref, w1a_ref, b1_ref,
                  w2_ref, b2_ref, w3_ref, b3_ref, o_ref):
    # Activations arrive as f32; cast to bf16 only at the MXU inputs.
    s16 = s_ref[...].astype(jnp.bfloat16)
    a16 = a_ref[...].astype(jnp.bfloat16)

    # fc1 (concat replaced by split matmul) + LeakyReLU, f32 accumulate.
    h1 = (jnp.dot(s16, w1s_ref[...], preferred_element_type=jnp.float32)
          + jnp.dot(a16, w1a_ref[...], preferred_element_type=jnp.float32)
          + b1_ref[...])
    h1 = _leaky_relu(h1)

    # fc2 + LeakyReLU.
    h2 = jnp.dot(h1.astype(jnp.bfloat16), w2_ref[...],
                 preferred_element_type=jnp.float32) + b2_ref[...]
    h2 = _leaky_relu(h2)

    # fc3 (no activation); W3 kept in f32, output width is the true a_dim
    # (narrow masked store is cheap — kernel has large store-slot slack and
    # is DMA-bound, so the 32x smaller writeback dominates).
    q = jnp.dot(h2, w3_ref[...], preferred_element_type=jnp.float32) + b3_ref[...]
    o_ref[...] = q.astype(o_ref.dtype)


# ----------------------------------------------------------------------------
# Wrapper
# ----------------------------------------------------------------------------
def critic_forward(state, action, kparams, *, tm=1024):
    """state: (B, s_dim) f32, action: (B, a_dim) f32 -> (B, a_dim) f32."""
    w1s, w1a, b1, w2, b2, w3, b3 = kparams
    B, s_dim = state.shape
    a_in = action.shape[1]
    a_out = w3.shape[1]  # true a_dim (no lane padding)

    # Row tile: block row dim must be a multiple of 8 or equal the full batch.
    # Cap TM so the grid has >= 2 steps when possible (v7x: both TensorCores);
    # tm (default 1024) bounds per-step VMEM — at h_pad=128 this is well under
    # the v5e 16 MiB scoped-VMEM default, so no vmem_limit override needed.
    if B <= SUBLANE:
        TM = B
    else:
        TM = min(tm, _round_up(pl.cdiv(B, 2), SUBLANE))
    grid = (pl.cdiv(B, TM),)

    out = pl.pallas_call(
        critic_kernel,
        out_shape=jax.ShapeDtypeStruct((B, a_out), jnp.float32),
        grid=grid,
        in_specs=[
            # Batch-tiled activations (partial last block masked by Pallas).
            pl.BlockSpec((TM, s_dim), lambda i: (i, 0)),
            pl.BlockSpec((TM, a_in), lambda i: (i, 0)),
            # Weights/biases: full-extent blocks, VMEM-resident across steps.
            pl.BlockSpec(w1s.shape, lambda i: (0, 0)),
            pl.BlockSpec(w1a.shape, lambda i: (0, 0)),
            pl.BlockSpec(b1.shape, lambda i: (0, 0)),
            pl.BlockSpec(w2.shape, lambda i: (0, 0)),
            pl.BlockSpec(b2.shape, lambda i: (0, 0)),
            pl.BlockSpec(w3.shape, lambda i: (0, 0)),
            pl.BlockSpec(b3.shape, lambda i: (0, 0)),
        ],
        out_specs=pl.BlockSpec((TM, a_out), lambda i: (i, 0)),
        compiler_params=pltpu.CompilerParams(
            dimension_semantics=("parallel",)),
    )(state, action, w1s, w1a, b1, w2, b2, w3, b3)

    return out


# ----------------------------------------------------------------------------
# Parameters
# ----------------------------------------------------------------------------
def init_critic_params(key, s_dim, hidden_size, a_dim):
    """Raw parameters in PyTorch layout: weights (out, in) f32, biases (out,) f32.

    Weights ~ N(0, 0.1) (as in the module), biases ~ U(-1/sqrt(fan_in), ...)
    (PyTorch Linear default bias init).
    """
    ks = jax.random.split(key, 6)

    def linear(kw, kb, in_f, out_f):
        w = 0.1 * jax.random.normal(kw, (out_f, in_f), dtype=jnp.float32)
        bound = 1.0 / math.sqrt(in_f)
        b = jax.random.uniform(kb, (out_f,), minval=-bound, maxval=bound,
                               dtype=jnp.float32)
        return w, b

    w1, b1 = linear(ks[0], ks[1], s_dim + a_dim, hidden_size)
    w2, b2 = linear(ks[2], ks[3], hidden_size, hidden_size)
    w3, b3 = linear(ks[4], ks[5], hidden_size, a_dim)
    return ((w1, b1), (w2, b2), (w3, b3))


def prepare_kernel_params(raw, s_dim, hidden_size, a_dim):
    """Transpose to (in, out), split fc1, zero-pad the hidden dim to 128.
    W1/W2 are cast to bf16; W3/b3 and biases stay f32.  The output feature dim
    is NOT padded (kept at a_dim).  Done once, off the hot path."""
    (w1, b1), (w2, b2), (w3, b3) = raw
    h_pad = _round_up(hidden_size, LANE)

    w1_t = w1.T  # (s_dim + a_dim, H)
    w1s = jnp.zeros((s_dim, h_pad), jnp.float32).at[:, :hidden_size].set(w1_t[:s_dim])
    w1a = jnp.zeros((a_dim, h_pad), jnp.float32).at[:, :hidden_size].set(w1_t[s_dim:])
    b1p = jnp.zeros((1, h_pad), jnp.float32).at[0, :hidden_size].set(b1)

    w2p = jnp.zeros((h_pad, h_pad), jnp.float32).at[:hidden_size, :hidden_size].set(w2.T)
    b2p = jnp.zeros((1, h_pad), jnp.float32).at[0, :hidden_size].set(b2)

    # fc3: pad only K (hidden); keep output width = a_dim and keep f32.
    w3p = jnp.zeros((h_pad, a_dim), jnp.float32).at[:hidden_size, :].set(w3.T)
    b3p = b3.reshape(1, a_dim).astype(jnp.float32)

    return (w1s.astype(jnp.bfloat16), w1a.astype(jnp.bfloat16), b1p,
            w2p.astype(jnp.bfloat16), b2p,
            w3p, b3p)


def critic_reference(state, action, raw):
    """Pure-JAX f32 reference matching the PyTorch module exactly."""
    (w1, b1), (w2, b2), (w3, b3) = raw
    x = jnp.concatenate([state, action], axis=1)
    x = jnp.where(x @ w1.T + b1 >= 0, x @ w1.T + b1, LEAKY_SLOPE * (x @ w1.T + b1))
    x = jnp.where(x @ w2.T + b2 >= 0, x @ w2.T + b2, LEAKY_SLOPE * (x @ w2.T + b2))
    return x @ w3.T + b3


# ----------------------------------------------------------------------------
# Demo / correctness check
# ----------------------------------------------------------------------------
if __name__ == "__main__":
    # Small shapes consistent with Critic(s_dim, hidden_size, a_dim)
    B, s_dim, hidden_size, a_dim = 4, 8, 32, 4

    key = jax.random.PRNGKey(0)
    k_params, k_state, k_action, k_state2, k_action2 = jax.random.split(key, 5)

    raw = init_critic_params(k_params, s_dim, hidden_size, a_dim)
    kparams = prepare_kernel_params(raw, s_dim, hidden_size, a_dim)

    # --- small batch (B=4 -> single full-array block) ---
    state = jax.random.normal(k_state, (B, s_dim), dtype=jnp.float32)
    action = jax.random.normal(k_action, (B, a_dim), dtype=jnp.float32)

    q = critic_forward(state, action, kparams)
    q = jax.block_until_ready(q)
    q_ref = critic_reference(state, action, raw)
    assert q.shape == (B, a_dim), q.shape
    # bf16 MXU inputs on fc1/fc2 with f32 accumulation -> relaxed tolerance.
    assert jnp.allclose(q, q_ref, atol=2e-2, rtol=2e-2), (
        f"mismatch: max abs err {jnp.max(jnp.abs(q - q_ref))}")

    # --- larger batch exercising the batch grid (2 steps, partial last block) ---
    B2 = 1000
    state2 = jax.random.normal(k_state2, (B2, s_dim), dtype=jnp.float32)
    action2 = jax.random.normal(k_action2, (B2, a_dim), dtype=jnp.float32)
    q2 = jax.block_until_ready(critic_forward(state2, action2, kparams))
    q2_ref = critic_reference(state2, action2, raw)
    assert q2.shape == (B2, a_dim), q2.shape
    assert jnp.allclose(q2, q2_ref, atol=2e-2, rtol=2e-2), (
        f"mismatch (B={B2}): max abs err {jnp.max(jnp.abs(q2 - q2_ref))}")

    print("KERNEL_OK")
</pallas_src>

<mosaic_0001>
module attributes {stable_mosaic.version = 11 : i64} {
  func.func @critic_kernel(%arg0: i32, %arg1: memref<4x8xf32, #tpu.memory_space<vmem>>, %arg2: memref<4x4xf32, #tpu.memory_space<vmem>>, %arg3: memref<8x128xbf16, #tpu.memory_space<vmem>>, %arg4: memref<4x128xbf16, #tpu.memory_space<vmem>>, %arg5: memref<1x128xf32, #tpu.memory_space<vmem>>, %arg6: memref<128x128xbf16, #tpu.memory_space<vmem>>, %arg7: memref<1x128xf32, #tpu.memory_space<vmem>>, %arg8: memref<128x4xf32, #tpu.memory_space<vmem>>, %arg9: memref<1x4xf32, #tpu.memory_space<vmem>>, %arg10: memref<4x4xf32, #tpu.memory_space<vmem>>) attributes {dimension_semantics = [#tpu.dimension_semantics<parallel>], iteration_bounds = array<i64: 1>, scalar_prefetch = 0 : i64, scratch_operands = 0 : i64, tpu.core_type = #tpu.core_type<tc>, window_params = [{transform_indices = @transform_0, window_bounds = array<i64: 4, 8>}, {transform_indices = @transform_1, window_bounds = array<i64: 4, 4>}, {pipeline_mode = #tpu.pipeline_mode<synchronous>, transform_indices = @transform_2, window_bounds = array<i64: 8, 128>}, {pipeline_mode = #tpu.pipeline_mode<synchronous>, transform_indices = @transform_3, window_bounds = array<i64: 4, 128>}, {pipeline_mode = #tpu.pipeline_mode<synchronous>, transform_indices = @transform_4, window_bounds = array<i64: 1, 128>}, {pipeline_mode = #tpu.pipeline_mode<synchronous>, transform_indices = @transform_5, window_bounds = array<i64: 128, 128>}, {pipeline_mode = #tpu.pipeline_mode<synchronous>, transform_indices = @transform_6, window_bounds = array<i64: 1, 128>}, {pipeline_mode = #tpu.pipeline_mode<synchronous>, transform_indices = @transform_7, window_bounds = array<i64: 128, 4>}, {pipeline_mode = #tpu.pipeline_mode<synchronous>, transform_indices = @transform_8, window_bounds = array<i64: 1, 4>}, {transform_indices = @transform_9, window_bounds = array<i64: 4, 4>}]} {
    %c0 = arith.constant 0 : index
    %c0_0 = arith.constant 0 : index
    %0 = vector.load %arg1[%c0, %c0_0] : memref<4x8xf32, #tpu.memory_space<vmem>>, vector<4x8xf32>
    %1 = arith.truncf %0 : vector<4x8xf32> to vector<4x8xbf16>
    %c0_1 = arith.constant 0 : index
    %c0_2 = arith.constant 0 : index
    %2 = vector.load %arg2[%c0_1, %c0_2] : memref<4x4xf32, #tpu.memory_space<vmem>>, vector<4x4xf32>
    %3 = arith.truncf %2 : vector<4x4xf32> to vector<4x4xbf16>
    %c0_3 = arith.constant 0 : index
    %c0_4 = arith.constant 0 : index
    %4 = vector.load %arg3[%c0_3, %c0_4] : memref<8x128xbf16, #tpu.memory_space<vmem>>, vector<8x128xbf16>
    %cst = arith.constant dense<0.000000e+00> : vector<4x128xf32>
    %5 = tpu.matmul %1, %4, %cst {dimension_numbers = #tpu.dot_dimension_numbers<[1], [0], [0], [1], [0, 0, 1, 1], [], []>} : vector<4x8xbf16>, vector<8x128xbf16>, vector<4x128xf32> -> vector<4x128xf32>
    %c0_5 = arith.constant 0 : index
    %c0_6 = arith.constant 0 : index
    %6 = vector.load %arg4[%c0_5, %c0_6] : memref<4x128xbf16, #tpu.memory_space<vmem>>, vector<4x128xbf16>
    %cst_7 = arith.constant dense<0.000000e+00> : vector<4x128xf32>
    %7 = tpu.matmul %3, %6, %cst_7 {dimension_numbers = #tpu.dot_dimension_numbers<[1], [0], [0], [1], [0, 0, 1, 1], [], []>} : vector<4x4xbf16>, vector<4x128xbf16>, vector<4x128xf32> -> vector<4x128xf32>
    %8 = arith.addf %5, %7 : vector<4x128xf32>
    %c0_8 = arith.constant 0 : index
    %c0_9 = arith.constant 0 : index
    %9 = vector.load %arg5[%c0_8, %c0_9] : memref<1x128xf32, #tpu.memory_space<vmem>>, vector<1x128xf32>
    %10 = vector.broadcast %9 : vector<1x128xf32> to vector<4x128xf32>
    %11 = arith.addf %8, %10 : vector<4x128xf32>
    %cst_10 = arith.constant 0.00999999977 : f32
    %12 = vector.broadcast %cst_10 : f32 to vector<4x128xf32>
    %13 = arith.mulf %12, %11 : vector<4x128xf32>
    %14 = arith.maximumf %11, %13 : vector<4x128xf32>
    %15 = arith.truncf %14 : vector<4x128xf32> to vector<4x128xbf16>
    %c0_11 = arith.constant 0 : index
    %c0_12 = arith.constant 0 : index
    %16 = vector.load %arg6[%c0_11, %c0_12] : memref<128x128xbf16, #tpu.memory_space<vmem>>, vector<128x128xbf16>
    %cst_13 = arith.constant dense<0.000000e+00> : vector<4x128xf32>
    %17 = tpu.matmul %15, %16, %cst_13 {dimension_numbers = #tpu.dot_dimension_numbers<[1], [0], [0], [1], [0, 0, 1, 1], [], []>} : vector<4x128xbf16>, vector<128x128xbf16>, vector<4x128xf32> -> vector<4x128xf32>
    %c0_14 = arith.constant 0 : index
    %c0_15 = arith.constant 0 : index
    %18 = vector.load %arg7[%c0_14, %c0_15] : memref<1x128xf32, #tpu.memory_space<vmem>>, vector<1x128xf32>
    %19 = vector.broadcast %18 : vector<1x128xf32> to vector<4x128xf32>
    %20 = arith.addf %17, %19 : vector<4x128xf32>
    %cst_16 = arith.constant 0.00999999977 : f32
    %21 = vector.broadcast %cst_16 : f32 to vector<4x128xf32>
    %22 = arith.mulf %21, %20 : vector<4x128xf32>
    %23 = arith.maximumf %20, %22 : vector<4x128xf32>
    %c0_17 = arith.constant 0 : index
    %c0_18 = arith.constant 0 : index
    %24 = vector.load %arg8[%c0_17, %c0_18] : memref<128x4xf32, #tpu.memory_space<vmem>>, vector<128x4xf32>
    %cst_19 = arith.constant dense<0.000000e+00> : vector<4x4xf32>
    %25 = tpu.matmul %23, %24, %cst_19 {dimension_numbers = #tpu.dot_dimension_numbers<[1], [0], [0], [1], [0, 0, 1, 1], [], []>} : vector<4x128xf32>, vector<128x4xf32>, vector<4x4xf32> -> vector<4x4xf32>
    %c0_20 = arith.constant 0 : index
    %c0_21 = arith.constant 0 : index
    %26 = vector.load %arg9[%c0_20, %c0_21] : memref<1x4xf32, #tpu.memory_space<vmem>>, vector<1x4xf32>
    %27 = vector.broadcast %26 : vector<1x4xf32> to vector<4x4xf32>
    %28 = arith.addf %25, %27 : vector<4x4xf32>
    %c0_22 = arith.constant 0 : index
    %c0_23 = arith.constant 0 : index
    %29 = vector.load %arg10[%c0_22, %c0_23] : memref<4x4xf32, #tpu.memory_space<vmem>>, vector<4x4xf32>
    tpu.vector_store %arg10[%c0_22, %c0_23], %28 {strides = array<i32>} : memref<4x4xf32, #tpu.memory_space<vmem>>, vector<4x4xf32>,
    return
  }
  func.func @transform_0(%arg0: i32) -> (i32, i32) {
    %c0_i32 = arith.constant 0 : i32
    %c0_i32_0 = arith.constant 0 : i32
    return %arg0, %c0_i32 : i32, i32
  }
  func.func @transform_1(%arg0: i32) -> (i32, i32) {
    %c0_i32 = arith.constant 0 : i32
    %c0_i32_0 = arith.constant 0 : i32
    return %arg0, %c0_i32 : i32, i32
  }
  func.func @transform_2(%arg0: i32) -> (i32, i32) {
    %c0_i32 = arith.constant 0 : i32
    %c0_i32_0 = arith.constant 0 : i32
    %c0_i32_1 = arith.constant 0 : i32
    return %c0_i32, %c0_i32_0 : i32, i32
  }
  func.func @transform_3(%arg0: i32) -> (i32, i32) {
    %c0_i32 = arith.constant 0 : i32
    %c0_i32_0 = arith.constant 0 : i32
    %c0_i32_1 = arith.constant 0 : i32
    return %c0_i32, %c0_i32_0 : i32, i32
  }
  func.func @transform_4(%arg0: i32) -> (i32, i32) {
    %c0_i32 = arith.constant 0 : i32
    %c0_i32_0 = arith.constant 0 : i32
    %c0_i32_1 = arith.constant 0 : i32
    return %c0_i32, %c0_i32_0 : i32, i32
  }
  func.func @transform_5(%arg0: i32) -> (i32, i32) {
    %c0_i32 = arith.constant 0 : i32
    %c0_i32_0 = arith.constant 0 : i32
    %c0_i32_1 = arith.constant 0 : i32
    return %c0_i32, %c0_i32_0 : i32, i32
  }
  func.func @transform_6(%arg0: i32) -> (i32, i32) {
    %c0_i32 = arith.constant 0 : i32
    %c0_i32_0 = arith.constant 0 : i32
    %c0_i32_1 = arith.constant 0 : i32
    return %c0_i32, %c0_i32_0 : i32, i32
  }
  func.func @transform_7(%arg0: i32) -> (i32, i32) {
    %c0_i32 = arith.constant 0 : i32
    %c0_i32_0 = arith.constant 0 : i32
    %c0_i32_1 = arith.constant 0 : i32
    return %c0_i32, %c0_i32_0 : i32, i32
  }
  func.func @transform_8(%arg0: i32) -> (i32, i32) {
    %c0_i32 = arith.constant 0 : i32
    %c0_i32_0 = arith.constant 0 : i32
    %c0_i32_1 = arith.constant 0 : i32
    return %c0_i32, %c0_i32_0 : i32, i32
  }
  func.func @transform_9(%arg0: i32) -> (i32, i32) {
    %c0_i32 = arith.constant 0 : i32
    %c0_i32_0 = arith.constant 0 : i32
    return %arg0, %c0_i32 : i32, i32
  }
}

</mosaic_0001>

<bundles_post_ra>
// kernel: tpu_custom_call.1
= control target key start
LH: loop header
LB: loop body
LE: loop exit
PB: predicated region body
PF: predicated region fallthrough
CT: control target
= control target key end

     0   :  { %vm44_vm0 = vcmask 1041408   ;;  %v539_v2 = vmov 0.0   ;;  %vm92_vm1 = vcmask 1043456   ;;  %vm540_vm2 = vmmov 0   ;;  %s702_s0 = inlined_call_operand.vmem [shape: f32[4,8], index: 0, kind: input, shape index: {}]   ;;  %s703_s1 = inlined_call_operand.vmem [shape: f32[4,4], index: 1, kind: input, shape index: {}]   ;;  %s704_s2 = inlined_call_operand.vmem [shape: bf16[8,128], index: 2, kind: input, shape index: {}]   ;;  %s705_s3 = inlined_call_operand.vmem [shape: bf16[4,128], index: 3, kind: input, shape index: {}]   ;;  %s706_s4 = inlined_call_operand.vmem [shape: f32[1,128], index: 4, kind: input, shape index: {}]   ;;  %s707_s5 = inlined_call_operand.vmem [shape: bf16[128,128], index: 5, kind: input, shape index: {}]   ;;  %s708_s6 = inlined_call_operand.vmem [shape: f32[1,128], index: 6, kind: input, shape index: {}]   ;;  %s709_s7 = inlined_call_operand.vmem [shape: f32[128,4], index: 7, kind: input, shape index: {}]   ;;  %s710_s8 = inlined_call_operand.vmem [shape: f32[1,4], index: 8, kind: input, shape index: {}]   ;;  %s711_s9 = inlined_call_operand.hbm [shape: f32[4,4], index: 9, kind: output, shape index: {}]  }
   0x1   :  { %v39_v0 = vld [vmem:[%s705_s3] sm:$0x3]  ;;  %412 = vmatprep.subr.bf16.mxu0 %v539_v2  ;;  %418 = vmatprep.subr.bf16.mxu1 %v539_v2  ;;  %vm40_vm3 = vcmask 31744   ;;  %vm88_vm4 = vcmask 64512   ;;  %v508_v10 = vld [vmem:[%s707_s5 + $0x8] sm:$0xff]  }
   0x2   :  { %v38_v1 = vld [vmem:[%s704_s2] sm:$0xf]  ;;  %v46_v3 = vsel %vm44_vm0, %v39_v0, 0  ;;  %414 = vmatprep.mubr.msk.bf16.mxu0 %vm540_vm2, %v539_v2  ;;  %420 = vmatprep.mubr.msk.bf16.mxu1 %vm540_vm2, %v539_v2 }
   0x3   :  { %v36_v4 = vld [vmem:[%s703_s1] sm:$0xf]  ;;  %413 = vmatpush3.bf16.msra.mxu0 %v46_v3  ;;  %v94_v5 = vsel %vm92_vm1, %v38_v1, 0 }
   0x4   :  { %v37_v6 = vpack.c.bf16 %v36_v4, %v36_v4  ;;  %v34_v7 = vld [vmem:[%s702_s0] sm:$0xf]  ;;  %419 = vmatpush3.bf16.msra.mxu1 %v94_v5  ;;  %424 = vmatprep.subr.bf16.mxu0 %v539_v2 }
   0x5   :  { %v35_v8 = vpack.c.bf16 %v34_v7, %v34_v7  ;;  %v507_v9 = vld [vmem:[%s707_s5] sm:$0xff]  }
   0x6   :  { %415 = vmatmul.mubr.msk.bf16.vlgmr.msra.gmra.mrb[0].mxu0 %vm40_vm3, %v37_v6 }
   0x7   :  { %421 = vmatmul.mubr.msk.bf16.vlgmr.msra.gmra.mrb[0].mxu1 %vm88_vm4, %v35_v8  ;;  %425 = vmatpush3.bf16.msra.mxu0 %v507_v9 }
   0x8   :  { %426 = vmatprep.subr.bf16.mxu0 %v539_v2  ;;  %440 = vmatprep.mubr.msk.bf16.mxu0 %vm540_vm2, %v539_v2 }
   0x9   :  { %476 = vmatprep.mubr.msk.f32.mxu1 %vm540_vm2, %v539_v2 }
   0xa   :  { %14 = vsyncpa [#allocation3], 0  ;;  %v509_v11 = vld [vmem:[%s707_s5 + $0x10] sm:$0xff]   ;;  %v510_v12 = vld [vmem:[%s707_s5 + $0x18] sm:$0xff]   ;;  %v541_v20 = vmov 0.0|0.0   ;;  %s542_s16 = smov [#allocation2]  }
   0xb   :  { %427 = vmatpush3.bf16.msra.mxu0 %v508_v10  ;;  %v511_v13 = vld [vmem:[%s707_s5 + $0x20] sm:$0xff]   ;;  %v512_v14 = vld [vmem:[%s707_s5 + $0x28] sm:$0xff]   ;;  %v513_v15 = vld [vmem:[%s707_s5 + $0x30] sm:$0xff]   ;;  %479 = vmatprep.subr.bf16.mxu1 %v541_v20  ;;  %vm353_vm5 = vcmask 27648  }
   0xc   :  { %428 = vmatprep.subr.bf16.mxu0 %v539_v2  ;;  %v514_v16 = vld [vmem:[%s707_s5 + $0x38] sm:$0xff]   ;;  %v260_v17 = vld [vmem:[%s709_s7] sm:$0xff]  ;;  %v261_v18 = vld [vmem:[%s709_s7 + $0x8] sm:$0xff] }
   0xd   :  { %v262_v19 = vld [vmem:[%s709_s7 + $0x10] sm:$0xff]  ;;  %v480_v21 = vpack.c.bf16 %v261_v18, %v260_v17  ;;  %v263_v22 = vld [vmem:[%s709_s7 + $0x18] sm:$0xff]  ;;  %v264_v24 = vld [vmem:[%s709_s7 + $0x20] sm:$0xff] }
   0xe   :  { %v483_v23 = vpack.c.bf16 %v263_v22, %v262_v19  ;;  %v265_v25 = vld [vmem:[%s709_s7 + $0x28] sm:$0xff]  ;;  %v266_v27 = vld [vmem:[%s709_s7 + $0x30] sm:$0xff]  ;;  %v267_v28 = vld [vmem:[%s709_s7 + $0x38] sm:$0xff] }
   0xf   :  { %429 = vmatpush3.bf16.msra.mxu0 %v509_v11  ;;  %481 = vmatpush3.bf16.msra.mxu1 %v480_v21  ;;  %v486_v26 = vpack.c.bf16 %v265_v25, %v264_v24  ;;  %v489_v29 = vpack.c.bf16 %v267_v28, %v266_v27  ;;  %v268_v30 = vld [vmem:[%s709_s7 + $0x40] sm:$0xff]  ;;  %v269_v31 = vld [vmem:[%s709_s7 + $0x48] sm:$0xff]  ;;  %v270_v33 = vld [vmem:[%s709_s7 + $0x50] sm:$0xff] }
  0x10   :  { %430 = vmatprep.subr.bf16.mxu0 %v539_v2  ;;  %482 = vmatprep.subr.bf16.mxu1 %v541_v20  ;;  %v492_v32 = vpack.c.bf16 %v269_v31, %v268_v30  ;;  %v271_v34 = vld [vmem:[%s709_s7 + $0x58] sm:$0xff]  ;;  %v371_v38 = vld [vmem:[%s706_s4] ss:$0 sm:$0xff]  ;;  %v273_v51 = vld [vmem:[%s709_s7 + $0x68] sm:$0xff] }
  0x11   :  { %v495_v35 = vpack.c.bf16 %v271_v34, %v270_v33  ;;  %v272_v50 = vld [vmem:[%s709_s7 + $0x60] sm:$0xff]  ;;  %v274_v53 = vld [vmem:[%s709_s7 + $0x70] sm:$0xff]  ;;  %v275_v54 = vld [vmem:[%s709_s7 + $0x78] sm:$0xff]  ;;  %s361_s7 = sshll.u32 %s542_s16, 4  ;;  %s362_s7 = int_to_ptr.vmem [resolvable:$true] %s361_s7 }
  0x12   :  { %v498_v52 = vpack.c.bf16 %v273_v51, %v272_v50  ;;  %v501_v55 = vpack.c.bf16 %v275_v54, %v274_v53  ;;  %v372_v56 = vld [vmem:[%s708_s6] ss:$0 sm:$0xff]  ;;  %s515_s6 = scalar_lea.vmem %s362_s7, 64  ;;  %p520_p1 = scmp.lt.s32.totalorder %s362_s7, %s362_s7 }
  0x13   :  { %431 = vmatpush3.bf16.msra.mxu0 %v510_v12  ;;  %484 = vmatpush3.bf16.msra.mxu1 %v483_v23  ;;  %v381_v0 = vld [vmem:[%s710_s8] ss:$0 sm:$0xff]  ;;  %p516_p0 = scmp.ne.s32.totalorder %s362_s7, %s515_s6  ;;  %p521_p2 = scmp.lt.s32.totalorder %s515_s6, %s515_s6 }
  0x14   :  { %432 = vmatprep.subr.bf16.mxu0 %v539_v2  ;;  %485 = vmatprep.subr.bf16.mxu1 %v541_v20 }
  0x15   :  { %p522_p3 = por %p521_p2, %p520_p1 }
  0x17   :  { %433 = vmatpush3.bf16.msra.mxu0 %v511_v13  ;;  %487 = vmatpush3.bf16.msra.mxu1 %v486_v26  ;;  %p523_p4 = pnand %p522_p3, %p516_p0 }
  0x18   :  { %434 = vmatprep.subr.bf16.mxu0 %v539_v2  ;;  %488 = vmatprep.subr.bf16.mxu1 %v541_v20 }
  0x1b   :  { %435 = vmatpush3.bf16.msra.mxu0 %v512_v14  ;;  %490 = vmatpush3.bf16.msra.mxu1 %v489_v29 }
  0x1c   :  { %436 = vmatprep.subr.bf16.mxu0 %v539_v2  ;;  %491 = vmatprep.subr.bf16.mxu1 %v541_v20 }
  0x1f   :  { %437 = vmatpush3.bf16.msra.mxu0 %v513_v15  ;;  %493 = vmatpush3.bf16.msra.mxu1 %v492_v32 }
  0x20   :  { %438 = vmatprep.subr.bf16.mxu0 %v539_v2  ;;  %494 = vmatprep.subr.bf16.mxu1 %v541_v20 }
  0x23   :  { %439 = vmatpush3.bf16.msra.mxu0 %v514_v16  ;;  %496 = vmatpush3.bf16.msra.mxu1 %v495_v35 }
  0x24   :  { %497 = vmatprep.subr.bf16.mxu1 %v541_v20 }
  0x27   :  { %499 = vmatpush3.bf16.msra.mxu1 %v498_v52 }
  0x28   :  { %500 = vmatprep.subr.bf16.mxu1 %v541_v20 }
  0x2b   :  { %502 = vmatpush3.bf16.msra.mxu1 %v501_v55 }
  0xd9   :  { %v82_v36 = vpop.f32.mrb[0].mxu0 }
  0xda   :  { %v130_v37 = vpop.f32.mrb[0].mxu1  ;;  %v416_v39 = vpop.f32.mrb[1].mxu0 }
  0xdb   :  { %v131_v40 = vadd.f32 %v130_v37, %v82_v36  ;;  %v422_v41 = vpop.f32.mrb[1].mxu1  ;;  %v85_v42 = vpop.f32.mrb[2].mxu0 }
  0xdc   :  { %v133_v43 = vpop.f32.mrb[2].mxu1  ;;  %v417_v44 = vpop.f32.mrb[3].mxu0 }
  0xdd   :  { %v143_v45 = vadd.f32 %v371_v38, %v131_v40  ;;  %v423_v46 = vpop.f32.mrb[3].mxu1 }
  0xdf   :  { %v144_v47 = vmul.f32 0.01, %v143_v45 }
  0xe1   :  { %v145_v48 = vmax.f32 %v143_v45, %v144_v47 }
  0xe3   :  { %v146_v49 = vpack.c.bf16 %v145_v48, %v145_v48 }
  0xe5   :  { %441 = vmatmul.mubr.bf16.vlgmr.msra.gmra.mrb[4].mxu0 %v146_v49 }
 0x1b8   :  { %v252_v57 = vpop.f32.mrb[4].mxu0 }
 0x1b9   :  { %v253_v58 = vadd.f32 %v372_v56, %v252_v57  ;;  %v442_v59 = vpop.f32.mrb[5].mxu0 }
 0x1ba   :  { %v255_v60 = vpop.f32.mrb[6].mxu0 }
 0x1bb   :  { %v258_v61 = vmul.f32 0.01, %v253_v58  ;;  %v443_v62 = vpop.f32.mrb[7].mxu0 }
 0x1bd   :  { %v259_v63 = vmax.f32 %v253_v58, %v258_v61 }
 0x1bf   :  { %477 = vmatmul.mubr.f32.vlgmr.msra.gmra.mrb[4].mxu1 %v259_v63 }
 0x292   :  { %v349_v1 = vpop.f32.mrb[4].mxu1 }
 0x293   :  { %v350_v2 = vadd.f32 %v381_v0, %v349_v1  ;;  %v478_v3 = vpop.f32.mrb[5].mxu1 }
 0x295   :  { %354 = vst.msk [vmem:[#allocation2] sm:$0xf] %vm353_vm5, %v350_v2 }
 0x296   :  { %526 = shalt.err (!%p523_p4)
}
 0x297   :  { %s527_s0 = scalar_lea.hbm %s711_s9, 64 }
 0x298   :  { %p528_p5 = scmp.ne.s32.totalorder %s711_s9, %s527_s0  ;;  %p531_p6 = scmp.lt.u32.totalorder %s527_s0, %s711_s9 }
 0x29a   :  { %p533_p7 = pnand %p531_p6, %p528_p5 }
 0x29c   :  { %536 = shalt.err (!%p533_p7)
}
 0x29d   :  { %364 = dma.vmem_to_hbm [thread:$0]  %s362_s7, 64, %s711_s9, [#allocation3]  }
 0x29e   :  { %537 = dma.done.wait [#allocation3], 64  }
 0x29f   :  { %538 = vsyncadd [#allocation3], 4294967232 }
 0x2a0   :  { %368 = vsyncpa [#allocation3], 1 }

</bundles_post_ra>
